<compile_context>
chip_gen: v6e
topology: v6e:2x2x1
jax: 0.10.0
libtpu: 0.0.40
codegen_flags: <defaults>
</compile_context>

<pallas_src>
import functools

import jax
import jax.numpy as jnp
from jax.experimental import pallas as pl
from jax.experimental.pallas import tpu as pltpu

_LANE = 128
_VMEM_LIMIT_BYTES = 48 * 1024 * 1024   # headroom below v7x's 64 MiB physical VMEM


def _round_up(v, m):
    return (v + m - 1) // m * m


# --------------------------------------------------------------------------- #
# Kernel 1: fused GATv2 projection   g = x @ [Wl^T | Wr^T] + [bl | br]
# --------------------------------------------------------------------------- #
def _proj_kernel(x_ref, w_ref, b_ref, g_ref):
    g_ref[...] = (
        jnp.dot(x_ref[...], w_ref[...], preferred_element_type=jnp.float32)
        + b_ref[...]
    )


def _proj_call(x_p, w_packed, b_packed, tile_m):
    n_pad, f_pad = x_p.shape
    out_dim = w_packed.shape[1]
    return pl.pallas_call(
        _proj_kernel,
        out_shape=jax.ShapeDtypeStruct((n_pad, out_dim), jnp.float32),
        grid_spec=pltpu.PrefetchScalarGridSpec(
            num_scalar_prefetch=0,
            grid=(n_pad // tile_m,),
            in_specs=[
                pl.BlockSpec((tile_m, f_pad), lambda i: (i, 0)),   # streamed row tile
                pl.BlockSpec((f_pad, out_dim), lambda i: (0, 0)),  # resident fused weight
                pl.BlockSpec((1, out_dim), lambda i: (0, 0)),      # resident fused bias
            ],
            out_specs=pl.BlockSpec((tile_m, out_dim), lambda i: (i, 0)),
        ),
        compiler_params=pltpu.CompilerParams(
            dimension_semantics=("parallel",),
            vmem_limit_bytes=_VMEM_LIMIT_BYTES,
        ),
    )(x_p, w_packed, b_packed)


# --------------------------------------------------------------------------- #
# Kernel 2: GATv2 attention + head-mean + (conv bias+BatchNorm folded) + ReLU
# --------------------------------------------------------------------------- #
def _gatv2_attn_kernel(mask_ref, gl_ref, gr_ref, att_ref, ss_ref, out_ref):
    num_heads, cp = att_ref.shape
    tile_m = gr_ref.shape[0]

    mask = mask_ref[...] > 0.0                          # [tile_m, n_src]
    acc = jnp.zeros((tile_m, cp), jnp.float32)

    for h in range(num_heads):                          # static unroll (heads = 4)
        gl_h = gl_ref[:, h * cp:(h + 1) * cp]           # [n_src, cp]   (values & source term)
        gr_h = gr_ref[:, h * cp:(h + 1) * cp]           # [tile_m, cp]  (target term)
        a_h = att_ref[h:h + 1, :]                       # [1, cp]

        v = gr_h[:, None, :] + gl_h[None, :, :]         # [tile_m, n_src, cp]
        v = jnp.where(v > 0.0, v, 0.2 * v)              # LeakyReLU(negative_slope=0.2)
        s = jnp.sum(v * a_h[None, :, :], axis=-1)       # [tile_m, n_src]

        s = jnp.where(mask, s, -1e30)                   # mask non-edges
        s = s - jnp.max(s, axis=-1, keepdims=True)
        p = jnp.exp(s)
        alpha = p / jnp.sum(p, axis=-1, keepdims=True)  # softmax over in-edges

        acc = acc + jnp.dot(alpha, gl_h, preferred_element_type=jnp.float32)

    h_mean = acc * (1.0 / num_heads)                    # concat=False -> mean over heads
    scale = ss_ref[0:1, :]
    shift = ss_ref[1:2, :]
    out_ref[...] = jnp.maximum(h_mean * scale + shift, 0.0)   # folded bias+BN, then ReLU


def _attn_call(mask, g_packed, att_p, ss, tile_m):
    n_pad = mask.shape[0]
    num_heads, cp = att_p.shape
    hcp = num_heads * cp
    cost = pl.CostEstimate(
        flops=6 * num_heads * n_pad * n_pad * cp,
        transcendentals=num_heads * n_pad * n_pad,
        bytes_accessed=4 * (n_pad * n_pad + 2 * n_pad * hcp + n_pad * cp),
    )
    return pl.pallas_call(
        _gatv2_attn_kernel,
        out_shape=jax.ShapeDtypeStruct((n_pad, cp), jnp.float32),
        grid_spec=pltpu.PrefetchScalarGridSpec(
            num_scalar_prefetch=0,
            grid=(n_pad // tile_m,),
            in_specs=[
                pl.BlockSpec((tile_m, n_pad), lambda i: (i, 0)),   # adjacency mask row tile
                pl.BlockSpec((n_pad, hcp), lambda i: (0, 0)),      # GL: all sources, resident
                pl.BlockSpec((tile_m, hcp), lambda i: (i, 1)),     # GR: this target tile
                pl.BlockSpec((num_heads, cp), lambda i: (0, 0)),   # attention vectors
                pl.BlockSpec((2, cp), lambda i: (0, 0)),           # folded scale/shift
            ],
            out_specs=pl.BlockSpec((tile_m, cp), lambda i: (i, 0)),
        ),
        compiler_params=pltpu.CompilerParams(
            dimension_semantics=("parallel",),
            vmem_limit_bytes=_VMEM_LIMIT_BYTES,
        ),
        cost_estimate=cost,
    )(mask, g_packed, g_packed, att_p, ss)


# --------------------------------------------------------------------------- #
# Kernel 3: final Linear(hidden -> 2*z_dim) + mean over (real) nodes
# --------------------------------------------------------------------------- #
def _linear_mean_kernel(h_ref, w_ref, b_ref, out_ref, *, n_valid):
    i = pl.program_id(0)
    tile_m = h_ref.shape[0]

    @pl.when(i == 0)
    def _():
        out_ref[...] = jnp.zeros_like(out_ref)

    rows = i * tile_m + jax.lax.broadcasted_iota(jnp.int32, (tile_m, 1), 0)
    valid = (rows < n_valid).astype(jnp.float32)        # mask out padded node rows
    z = jnp.dot(h_ref[...], w_ref[...], preferred_element_type=jnp.float32)
    out_ref[...] += jnp.sum(z * valid, axis=0, keepdims=True)

    @pl.when(i == pl.num_programs(0) - 1)
    def _():
        out_ref[...] = out_ref[...] * (1.0 / n_valid) + b_ref[...]


def _linear_mean_call(h, w_lin, b_lin, n_valid, tile_m):
    n_pad, c_pad = h.shape
    z_pad = w_lin.shape[1]
    kernel = functools.partial(_linear_mean_kernel, n_valid=n_valid)
    return pl.pallas_call(
        kernel,
        out_shape=jax.ShapeDtypeStruct((1, z_pad), jnp.float32),
        grid_spec=pltpu.PrefetchScalarGridSpec(
            num_scalar_prefetch=0,
            grid=(n_pad // tile_m,),
            in_specs=[
                pl.BlockSpec((tile_m, c_pad), lambda i: (i, 0)),
                pl.BlockSpec((c_pad, z_pad), lambda i: (0, 0)),
                pl.BlockSpec((1, z_pad), lambda i: (0, 0)),
            ],
            out_specs=pl.BlockSpec((1, z_pad), lambda i: (0, 0)),  # resident accumulator
        ),
        compiler_params=pltpu.CompilerParams(
            dimension_semantics=("arbitrary",),
            vmem_limit_bytes=_VMEM_LIMIT_BYTES,
        ),
    )(h, w_lin, b_lin)


# --------------------------------------------------------------------------- #
# Host-side packing / padding glue (plain XLA, tiny)
# --------------------------------------------------------------------------- #
def _pad2d(a, rows, cols):
    out = jnp.zeros((rows, cols), jnp.float32)
    return out.at[: a.shape[0], : a.shape[1]].set(a.astype(jnp.float32))


def _pack_proj_weights(w_l, b_l, w_r, b_r, f_in, f_pad, num_heads, c, c_pad):
    """Fuse lin_l / lin_r into one [f_pad, 2*H*c_pad] weight + [1, 2*H*c_pad] bias.
    Each head's channels are padded c -> c_pad so heads are 128-lane aligned."""
    hcp = num_heads * c_pad
    w = jnp.zeros((f_pad, 2 * hcp), jnp.float32)
    b = jnp.zeros((1, 2 * hcp), jnp.float32)
    wlt, wrt = w_l.T, w_r.T                       # [f_in, H*c]
    for h in range(num_heads):
        w = w.at[:f_in, h * c_pad:h * c_pad + c].set(wlt[:, h * c:(h + 1) * c])
        w = w.at[:f_in, hcp + h * c_pad:hcp + h * c_pad + c].set(wrt[:, h * c:(h + 1) * c])
        b = b.at[0, h * c_pad:h * c_pad + c].set(b_l[h * c:(h + 1) * c])
        b = b.at[0, hcp + h * c_pad:hcp + h * c_pad + c].set(b_r[h * c:(h + 1) * c])
    return w, b


def _fold_bias_batchnorm(conv_bias, bn, c_pad, eps=1e-5):
    """Fold GATv2 output bias + eval-mode BatchNorm into per-channel scale/shift."""
    scale = bn["gamma"] / jnp.sqrt(bn["var"] + eps)
    shift = (conv_bias - bn["mean"]) * scale + bn["beta"]
    ss = jnp.zeros((2, c_pad), jnp.float32)
    ss = ss.at[0, : scale.shape[0]].set(scale)
    ss = ss.at[1, : shift.shape[0]].set(shift)
    return ss


def _build_mask(edge_index, num_nodes, n_pad):
    """Dense edge mask: row i = target, col j = source; add_self_loops=True."""
    src, dst = edge_index[0], edge_index[1]
    m = jnp.zeros((n_pad, n_pad), jnp.float32)
    m = m.at[dst, src].set(1.0)
    idx = jnp.arange(num_nodes)
    m = m.at[idx, idx].set(1.0)
    return m


def gat_encoder_forward(x, edge_index, l, params, *, tile_m=8):
    """GATEncoder.forward (eval mode). Returns [2*z_dim] float32."""
    assert tile_m % 8 == 0
    n, in_c = x.shape
    heads, c = params["conv1"]["att"].shape
    two_z = params["lin"]["w"].shape[0]

    c_pad = _round_up(c, _LANE)
    f1_pad = _round_up(in_c, _LANE)
    f2_pad = _round_up(c + 1, _LANE)
    z_pad = _round_up(two_z, _LANE)
    n_pad = _round_up(n, tile_m)          # tile_m=8 for the toy demo; use 256+ for real N

    mask = _build_mask(edge_index, n, n_pad)

    # ---- layer 1: GATv2Conv(in_c -> hidden) + BatchNorm + ReLU -------------
    x_p = _pad2d(x, n_pad, f1_pad)
    w1, b1 = _pack_proj_weights(params["conv1"]["w_l"], params["conv1"]["b_l"],
                                params["conv1"]["w_r"], params["conv1"]["b_r"],
                                in_c, f1_pad, heads, c, c_pad)
    att1 = _pad2d(params["conv1"]["att"], heads, c_pad)
    ss1 = _fold_bias_batchnorm(params["conv1"]["bias"], params["bn1"], c_pad)
    g1 = _proj_call(x_p, w1, b1, tile_m)
    h1 = _attn_call(mask, g1, att1, ss1, tile_m)                 # [n_pad, c_pad]

    # dropout -> identity (eval);  x2 = cat([h1, l.unsqueeze(1)], dim=-1), padded
    l_p = jnp.zeros((n_pad,), jnp.float32).at[:n].set(l.astype(jnp.float32))
    x2_p = _pad2d(h1, n_pad, f2_pad).at[:, c].set(l_p)

    # ---- layer 2: GATv2Conv(hidden+1 -> hidden) + BatchNorm + ReLU ---------
    w2, b2 = _pack_proj_weights(params["conv2"]["w_l"], params["conv2"]["b_l"],
                                params["conv2"]["w_r"], params["conv2"]["b_r"],
                                c + 1, f2_pad, heads, c, c_pad)
    att2 = _pad2d(params["conv2"]["att"], heads, c_pad)
    ss2 = _fold_bias_batchnorm(params["conv2"]["bias"], params["bn2"], c_pad)
    g2 = _proj_call(x2_p, w2, b2, tile_m)
    h2 = _attn_call(mask, g2, att2, ss2, tile_m)                 # [n_pad, c_pad]

    # ---- Linear(hidden -> 2*z_dim) + mean over nodes (dim=0) ---------------
    w_lin = _pad2d(params["lin"]["w"].T, c_pad, z_pad)
    b_lin = _pad2d(params["lin"]["b"][None, :], 1, z_pad)
    out_p = _linear_mean_call(h2, w_lin, b_lin, n, tile_m)       # [1, z_pad]
    return out_p[0, :two_z]


def init_params(key, in_channels, hidden_channels, z_dim, heads=4):
    """Deterministic synthetic parameters (shapes match PyG GATv2Conv / BatchNorm / Linear)."""
    c = hidden_channels
    ks = jax.random.split(key, 8)

    def glorot(k, shape, fan_in):
        return jax.random.normal(k, shape, jnp.float32) / jnp.sqrt(float(fan_in))

    def bn(n_ch, off):
        r = jnp.arange(n_ch, dtype=jnp.float32)
        return {"gamma": 1.0 + 0.01 * r, "beta": 0.005 * r + off,
                "mean": 0.01 * r, "var": 1.0 + 0.02 * r}

    f1, f2 = in_channels, hidden_channels + 1
    return {
        "conv1": {
            "w_l": glorot(ks[0], (heads * c, f1), f1),
            "b_l": 0.01 * jnp.arange(heads * c, dtype=jnp.float32),
            "w_r": glorot(ks[1], (heads * c, f1), f1),
            "b_r": 0.02 * jnp.arange(heads * c, dtype=jnp.float32),
            "att": glorot(ks[2], (heads, c), c),
            "bias": 0.01 * jnp.arange(c, dtype=jnp.float32),
        },
        "bn1": bn(c, 0.0),
        "conv2": {
            "w_l": glorot(ks[3], (heads * c, f2), f2),
            "b_l": 0.01 * jnp.arange(heads * c, dtype=jnp.float32),
            "w_r": glorot(ks[4], (heads * c, f2), f2),
            "b_r": 0.02 * jnp.arange(heads * c, dtype=jnp.float32),
            "att": glorot(ks[5], (heads, c), c),
            "bias": 0.02 * jnp.arange(c, dtype=jnp.float32),
        },
        "bn2": bn(c, 0.01),
        "lin": {
            "w": glorot(ks[6], (2 * z_dim, c), c),
            "b": 0.03 * jnp.arange(2 * z_dim, dtype=jnp.float32),
        },
    }


if __name__ == "__main__":
    n, in_c, hidden, z_dim = 12, 4, 32, 16
    key = jax.random.PRNGKey(0)
    kx, kl, kp = jax.random.split(key, 3)

    x = jax.random.normal(kx, (n, in_c), jnp.float32)
    l = jax.random.normal(kl, (n,), jnp.float32)

    # deterministic directed graph: ring + a few chords (source row 0, target row 1)
    ring_src = jnp.arange(n, dtype=jnp.int32)
    ring_dst = jnp.roll(ring_src, -1)
    chord_src = jnp.array([0, 3, 5, 8], dtype=jnp.int32)
    chord_dst = jnp.array([6, 9, 1, 2], dtype=jnp.int32)
    edge_index = jnp.stack([jnp.concatenate([ring_src, chord_src]),
                            jnp.concatenate([ring_dst, chord_dst])])

    params = init_params(kp, in_c, hidden, z_dim)

    out = gat_encoder_forward(x, edge_index, l, params, tile_m=8)
    jax.block_until_ready(out)
    assert out.shape == (2 * z_dim,) and out.dtype == jnp.float32
    assert bool(jnp.all(jnp.isfinite(out)))
    print("KERNEL_OK")
</pallas_src>

<mosaic_0001>
module attributes {stable_mosaic.version = 11 : i64} {
  func.func @_proj_kernel(%arg0: i32, %arg1: memref<8x128xf32, #tpu.memory_space<vmem>>, %arg2: memref<128x1024xf32, #tpu.memory_space<vmem>>, %arg3: memref<1x1024xf32, #tpu.memory_space<vmem>>, %arg4: memref<8x1024xf32, #tpu.memory_space<vmem>>) attributes {dimension_semantics = [#tpu.dimension_semantics<parallel>], iteration_bounds = array<i64: 2>, scalar_prefetch = 0 : i64, scratch_operands = 0 : i64, tpu.core_type = #tpu.core_type<tc>, window_params = [{transform_indices = @transform_0, window_bounds = array<i64: 8, 128>}, {pipeline_mode = #tpu.pipeline_mode<synchronous>, transform_indices = @transform_1, window_bounds = array<i64: 128, 1024>}, {pipeline_mode = #tpu.pipeline_mode<synchronous>, transform_indices = @transform_2, window_bounds = array<i64: 1, 1024>}, {transform_indices = @transform_3, window_bounds = array<i64: 8, 1024>}]} {
    %c0 = arith.constant 0 : index
    %c0_0 = arith.constant 0 : index
    %0 = vector.load %arg1[%c0, %c0_0] : memref<8x128xf32, #tpu.memory_space<vmem>>, vector<8x128xf32>
    %c0_1 = arith.constant 0 : index
    %c0_2 = arith.constant 0 : index
    %1 = vector.load %arg2[%c0_1, %c0_2] : memref<128x1024xf32, #tpu.memory_space<vmem>>, vector<128x1024xf32>
    %cst = arith.constant dense<0.000000e+00> : vector<8x1024xf32>
    %2 = tpu.matmul %0, %1, %cst {dimension_numbers = #tpu.dot_dimension_numbers<[1], [0], [0], [1], [0, 0, 1, 1], [], []>} : vector<8x128xf32>, vector<128x1024xf32>, vector<8x1024xf32> -> vector<8x1024xf32>
    %c0_3 = arith.constant 0 : index
    %c0_4 = arith.constant 0 : index
    %3 = vector.load %arg3[%c0_3, %c0_4] : memref<1x1024xf32, #tpu.memory_space<vmem>>, vector<1x1024xf32>
    %4 = vector.broadcast %3 : vector<1x1024xf32> to vector<8x1024xf32>
    %5 = arith.addf %2, %4 : vector<8x1024xf32>
    %c0_5 = arith.constant 0 : index
    %c0_6 = arith.constant 0 : index
    %6 = vector.load %arg4[%c0_5, %c0_6] : memref<8x1024xf32, #tpu.memory_space<vmem>>, vector<8x1024xf32>
    tpu.vector_store %arg4[%c0_5, %c0_6], %5 {strides = array<i32>} : memref<8x1024xf32, #tpu.memory_space<vmem>>, vector<8x1024xf32>,
    return
  }
  func.func @transform_0(%arg0: i32) -> (i32, i32) {
    %c0_i32 = arith.constant 0 : i32
    %c0_i32_0 = arith.constant 0 : i32
    return %arg0, %c0_i32 : i32, i32
  }
  func.func @transform_1(%arg0: i32) -> (i32, i32) {
    %c0_i32 = arith.constant 0 : i32
    %c0_i32_0 = arith.constant 0 : i32
    %c0_i32_1 = arith.constant 0 : i32
    return %c0_i32, %c0_i32_0 : i32, i32
  }
  func.func @transform_2(%arg0: i32) -> (i32, i32) {
    %c0_i32 = arith.constant 0 : i32
    %c0_i32_0 = arith.constant 0 : i32
    %c0_i32_1 = arith.constant 0 : i32
    return %c0_i32, %c0_i32_0 : i32, i32
  }
  func.func @transform_3(%arg0: i32) -> (i32, i32) {
    %c0_i32 = arith.constant 0 : i32
    %c0_i32_0 = arith.constant 0 : i32
    return %arg0, %c0_i32 : i32, i32
  }
}

</mosaic_0001>

<bundles_post_ra>
// kernel: tpu_custom_call.1
= control target key start
LH: loop header
LB: loop body
LE: loop exit
PB: predicated region body
PF: predicated region fallthrough
CT: control target
= control target key end

     0   :  { %8 = vsyncpa [#allocation3], 0  ;;  %s1230_s0 = inlined_call_operand.hbm [shape: f32[16,128], index: 0, kind: input, shape index: {}]   ;;  %s1231_s1 = inlined_call_operand.hbm [shape: f32[128,1024], index: 1, kind: input, shape index: {}]   ;;  %s1232_s2 = inlined_call_operand.hbm [shape: f32[1,1024], index: 2, kind: input, shape index: {}]   ;;  %s1233_s3 = inlined_call_operand.hbm [shape: f32[16,1024], index: 3, kind: output, shape index: {}]  }
   0x1   :  { %10 = vsyncpa [#allocation3 + $0x1], 0 }
   0x2   :  { %11 = vsyncpa [#allocation6], 0 }
   0x3   :  { %12 = vsyncpa [#allocation4], 0 }
   0x4   :  { %14 = vsyncpa [#allocation4 + $0x1], 0  ;;  %s1045_s12 = smov 0   ;;  %s1047_s13 = smov 0  }
   0x5   :  { %s1049_s14 = smov 0   ;;  %s1051_s15 = smov 0  }
   0x6 LB: > { %s1066_s16 = sadd.s32 4294967295, %s1016_s15   ;;  %s780_s17 = sadd.s32 4294967294, %s1016_s15   ;;  %s1016_s15 = sphi %s1051_s15, %s1255_s15   ;;  %s1012_s14 = sphi %s1049_s14, %s1254_s14   ;;  %s1008_s13 = sphi %s1047_s13, %s1253_s13   ;;  %s1004_s12 = sphi %s1045_s12, %s1252_s12  }
   0x7   : > { %p40_p0 = scmp.ne.s32.totalorder %s1008_s13, %s1004_s12  ;;  %p1234_p1 = scmp.eq.s32.totalorder %s1066_s16, 0 }
   0x8   : > { %p112_p3 = scmp.eq.s32.totalorder %s780_s17, 1  ;;  %p781_p5 = scmp.ge.s32.totalorder %s1016_s15, 1 }
   0x9   : > { %p1075_p4 = por %p1234_p1, %p40_p0  ;;  %p119_p7 = scmp.lt.s32.totalorder %s1016_s15, 3 }
   0xa   : > { %p1080_p6 = por %p112_p3, %p40_p0  ;;  %s1018_s21 = smov [#allocation5]  }
   0xb   : > { %s1238_s18 = scalar_select %p1075_p4, 1, 0 }
   0xc   : > { %s1239_s19 = scalar_select %p1080_p6, 1, 0 }
   0xd   : > { %p1085_p8 = pnand %p781_p5, %p119_p7  ;;  %s131_s22 = sshll.u32 %s1018_s21, 4  ;;  %s132_s22 = int_to_ptr.vmem [resolvable:$true] %s131_s22 }
   0xe   : > { %s1019_s24 = smov [#allocation7]   ;;  %s879_s26 = scalar_lea.vmem %s132_s22, 16384 }
   0xf   : > { %s1240_s20 = scalar_select %p1085_p8, 1, 0 }
  0x10   : > { %p810_p9 = pneg %p1085_p8  ;;  %s145_s25 = sshll.u32 %s1019_s24, 4  ;;  %s146_s25 = int_to_ptr.vmem [resolvable:$true] %s145_s25 }
  0x11   : > { %p880_p13 = scmp.ne.s32.totalorder %s132_s22, %s879_s26  ;;  %p887_p5 = scmp.lt.s32.totalorder %s132_s22, %s132_s22 }
  0x12   : > { %p1094_p11 = pnand %p810_p9, %p1234_p1  ;;  %p888_p7 = scmp.lt.s32.totalorder %s879_s26, %s879_s26 }
  0x14   : > { %p870_p12 = pneg %p1094_p11  ;;  %p889_p10 = por %p888_p7, %p887_p5 }
  0x16   : > { %p882_p0 = pnand %p880_p13, %p870_p12 }
  0x18   : > { %p883_p3 = pneg %p882_p0 }
  0x1a   : > { %p890_p9 = pnand %p889_p10, %p883_p3 }
  0x1c   : > { %893 = shalt.err (!%p890_p9)
}
  0x1d   : > { %s1020_s27 = smov 1024   ;;  %s1021_s28 = smov 64  }
  0x1e   : > { %813 = dma.hbm_to_vmem [thread:$0]  (!%p1094_p11), %s1231_s1, 16384, %s132_s22, [#allocation6], %s1020_s27, %s1020_s27, %s1021_s28  }
  0x1f   : > { %s905_s4 = scalar_lea.vmem %s146_s25, 128  ;;  %p913_p2 = scmp.lt.s32.totalorder %s146_s25, %s146_s25 }
  0x20   : > { %p906_p1 = scmp.ne.s32.totalorder %s146_s25, %s905_s4  ;;  %p914_p6 = scmp.lt.s32.totalorder %s905_s4, %s905_s4 }
  0x22   : > { %p908_p13 = pnand %p906_p1, %p870_p12  ;;  %p915_p5 = por %p914_p6, %p913_p2 }
  0x24   : > { %p909_p0 = pneg %p908_p13 }
  0x26   : > { %p916_p10 = pnand %p915_p5, %p909_p0 }
  0x28   : > { %919 = shalt.err (!%p916_p10)
}
  0x29   : > { %816 = dma.hbm_to_vmem [thread:$0]  (!%p1094_p11), %s1232_s2, 128, %s146_s25, [#allocation6]  }
  0x2a   : > { %s1117_s7 = sadd.s32 1, %s1016_s15   ;;  %s27_s8 = sadd.s32 1, %s1012_s14 }
  0x2b   : > { %s24_s9 = ssub.s32 %s1016_s15, %s1117_s7  ;;  %p34_p1 = scmp.ne.s32.totalorder %s1012_s14, %s1008_s13 }
  0x2c   : > { %p25_p2 = scmp.eq.s32.totalorder %s24_s9, 0  ;;  %p35_p6 = scmp.eq.s32.totalorder %s1016_s15, 0 }
  0x2d   : > { %p1242_p12 = scmp.eq.s32.totalorder %s1066_s16, 1  ;;  %p827_p7 = scmp.lt.s32.totalorder %s1016_s15, 2 }
  0x2e   : > { %s1133_s11 = scalar_select %p25_p2, %s1012_s14, %s27_s8  }
  0x2f   : > { %p1127_p3 = por %p1242_p12, %p34_p1  ;;  %p36_p9 = por %p35_p6, %p34_p1 }
  0x30   : > { %s156_s17 = sand.u32 1, %s1012_s14   ;;  %s786_s22 = sshll.u32 %s1016_s15, 7 }
  0x31   : > { %s1243_s10 = scalar_select %p1127_p3, 1, 0 }
  0x32   : > { %s785_s21 = sshll.u32 %s156_s17, 3  ;;  %s1140_s25 = scalar_lea.hbm %s1230_s0, %s786_s22 }
  0x33   : > { %s160_s26 = scalar_lea.vmem [#allocation2], %s785_s21  ;;  %p1142_p11 = pnand %p827_p7, %p36_p9 }
  0x34   : > { %s167_s27 = sshll.u32 %s160_s26, 4  ;;  %s157_s29 = scalar_lea.sflag [#allocation3], %s156_s17  ;;  %s168_s27 = int_to_ptr.vmem [resolvable:$true] %s167_s27 }
  0x35   : > { %s920_s30 = scalar_lea.hbm %s1140_s25, 128  ;;  %p922_p0 = pneg %p1142_p11 }
  0x36   : > { %p921_p13 = scmp.ne.s32.totalorder %s1140_s25, %s920_s30  ;;  %s925_s6 = scalar_lea.hbm %s1230_s0, 256 }
  0x37   : > { %p926_p1 = scmp.lt.s32.totalorder %s1140_s25, %s1230_s0  ;;  %p927_p2 = scmp.lt.s32.totalorder %s925_s6, %s920_s30 }
  0x38   : > { %p923_p5 = pnand %p922_p0, %p921_p13 }
  0x39   : > { %p928_p6 = por %p927_p2, %p926_p1 }
  0x3a   : > { %p924_p10 = pneg %p923_p5 }
  0x3c   : > { %p929_p12 = pnand %p928_p6, %p924_p10 }
  0x3e   : > { %932 = shalt.err (!%p929_p12)
}
  0x3f   : > { %s933_s21 = scalar_lea.vmem %s168_s27, 128  ;;  %s1022_s17 = smov [#allocation2]  }
  0x40   : > { %p934_p7 = scmp.ne.s32.totalorder %s168_s27, %s933_s21  ;;  %s938_s22 = sshll.u32 %s1022_s17, 4  ;;  %s939_s22 = int_to_ptr.vmem [resolvable:$false] %s938_s22 }
  0x41   : > { %s940_s23 = scalar_lea.vmem %s939_s22, 256  ;;  %p941_p13 = scmp.lt.s32.totalorder %s168_s27, %s939_s22 }
  0x42   : > { %p936_p9 = pnand %p934_p7, %p922_p0  ;;  %p942_p5 = scmp.lt.s32.totalorder %s940_s23, %s933_s21 }
  0x44   : > { %p937_p3 = pneg %p936_p9  ;;  %p943_p4 = por %p942_p5, %p941_p13 }
  0x46   : > { %p944_p8 = pnand %p943_p4, %p937_p3 }
  0x48   : > { %947 = shalt.err (!%p944_p8)
}
  0x49   : > { %820 = dma.hbm_to_vmem [thread:$0]  (!%p1142_p11), %s1140_s25, 128, %s168_s27, %s157_s29  }
  0x4a   : > { %p1245_p10 = scmp.ne.s32.totalorder %s1240_s20, 0 }
  0x4b   : > { %s1163_s24 = sand.u32 (!%p1245_p10), 1, %s1008_s13   ;;  %p1246_p0 = scmp.ne.s32.totalorder (!%p1245_p10), %s1238_s18, 0 }
  0x4c   : > { %176 = sbr.rel (%p1245_p10) target bundleno = 363 (0x16b), region = 32  ;;  %s788_s26 = sshll.u32 (!%p1245_p10), %s1163_s24, 3 }
  0x4d   : > { %s179_s30 = scalar_lea.sflag (!%p1245_p10), [#allocation3], %s1163_s24  ;;  %s1167_s4 = scalar_lea.vmem (!%p1245_p10), [#allocation2], %s788_s26 }
  0x51   : > { %991 = dma.done.wait (%p1246_p0), %s179_s30, 128  }
  0x52   : > { %993 = vsyncadd (%p1246_p0), %s179_s30, 4294967168  ;;  %p1247_p4 = scmp.eq.s32.totalorder %s1066_s16, 0 }
  0x54   : > { %995 = dma.done.wait (%p1247_p4), [#allocation6], 16512   ;;  %p1248_p8 = pmov %p1247_p4 }
  0x55   : > { %v1023_v0 = vmov 0.0   ;;  %v335_v1 = vld [vmem:[#allocation5 + $0x3c8] sm:$0xff]  ;;  %v337_v2 = vld [vmem:[#allocation5 + $0x3d8] sm:$0xff]  ;;  %v334_v3 = vld [vmem:[#allocation5 + $0x3c0] sm:$0xff]  ;;  %s791_s18 = sshll.u32 %s1163_s24, 6  ;;  %s797_s25 = sshll.u32 %s1066_s16, 10 }
  0x56   : > { %997 = vsyncadd (%p1248_p8), [#allocation6], 4294950784  ;;  %448 = vmatprep.mubr.f32.mxu0 %v1023_v0  ;;  %519 = vmatprep.mubr.f32.mxu1 %v1023_v0  ;;  %v336_v4 = vld [vmem:[#allocation5 + $0x3d0] sm:$0xff]  ;;  %v327_v5 = vld [vmem:[#allocation5 + $0x388] sm:$0xff]  ;;  %s212_s20 = scalar_lea.vmem [#allocation8], %s791_s18  ;;  %s1193_s5 = scalar_lea.hbm %s1233_s3, %s797_s25 }
  0x57   : > { %384 = vmatprep.subr.mxu0 %v335_v1  ;;  %455 = vmatprep.subr.mxu1 %v337_v2  ;;  %v329_v6 = vld [vmem:[#allocation5 + $0x398] sm:$0xff]  ;;  %v326_v7 = vld [vmem:[#allocation5 + $0x380] sm:$0xff]  ;;  %v328_v8 = vld [vmem:[#allocation5 + $0x390] sm:$0xff]  ;;  %s691_s27 = sshll.u32 %s212_s20, 4  ;;  %s677_s6 = scalar_lea.sflag [#allocation4], %s1163_s24  ;;  %s692_s27 = int_to_ptr.vmem [resolvable:$true] %s691_s27 }
  0x58   : > { %385 = vmatpush1.msra.mxu0 %v334_v3  ;;  %456 = vmatpush1.msra.mxu1 %v336_v4  ;;  %v319_v9 = vld [vmem:[#allocation5 + $0x348] sm:$0xff]  ;;  %v321_v10 = vld [vmem:[#allocation5 + $0x358] sm:$0xff]  ;;  %v318_v11 = vld [vmem:[#allocation5 + $0x340] sm:$0xff]  ;;  %s948_s16 = scalar_lea.vmem %s692_s27, 1024  ;;  %p1249_p11 = scmp.ne.s32.totalorder %s1243_s10, 0 }
  0x59   : > { %386 = vmatprep.subr.mxu0 %v327_v5  ;;  %457 = vmatprep.subr.mxu1 %v329_v6  ;;  %v320_v12 = vld [vmem:[#allocation5 + $0x350] sm:$0xff]  ;;  %v311_v13 = vld [vmem:[#allocation5 + $0x308] sm:$0xff]  ;;  %v313_v14 = vld [vmem:[#allocation5 + $0x318] sm:$0xff]  ;;  %p949_p3 = scmp.ne.s32.totalorder %s692_s27, %s948_s16  ;;  %s1024_s8 = smov [#allocation8]  }
  0x5a   : > { %387 = vmatpush1.msra.mxu0 %v326_v7  ;;  %458 = vmatpush1.msra.mxu1 %v328_v8  ;;  %v310_v15 = vld [vmem:[#allocation5 + $0x300] sm:$0xff]  ;;  %v312_v16 = vld [vmem:[#allocation5 + $0x310] sm:$0xff]  ;;  %v303_v17 = vld [vmem:[#allocation5 + $0x2c8] sm:$0xff]  ;;  %s952_s9 = sshll.u32 %s1024_s8, 4  ;;  %s953_s9 = int_to_ptr.vmem [resolvable:$false] %s952_s9 }
  0x5b   : > { %388 = vmatprep.subr.mxu0 %v319_v9  ;;  %459 = vmatprep.subr.mxu1 %v321_v10  ;;  %v305_v18 = vld [vmem:[#allocation5 + $0x2d8] sm:$0xff]  ;;  %v302_v19 = vld [vmem:[#allocation5 + $0x2c0] sm:$0xff]  ;;  %v304_v20 = vld [vmem:[#allocation5 + $0x2d0] sm:$0xff]  ;;  %p950_p1 = pnand %p949_p3, %p1249_p11  ;;  %s954_s21 = scalar_lea.vmem %s953_s9, 2048 }
  0x5c   : > { %389 = vmatpush1.msra.mxu0 %v318_v11  ;;  %460 = vmatpush1.msra.mxu1 %v320_v12  ;;  %v295_v21 = vld [vmem:[#allocation5 + $0x288] sm:$0xff]  ;;  %v297_v22 = vld [vmem:[#allocation5 + $0x298] sm:$0xff]  ;;  %v294_v23 = vld [vmem:[#allocation5 + $0x280] sm:$0xff]  ;;  %p955_p6 = scmp.lt.s32.totalorder %s692_s27, %s953_s9  ;;  %p956_p12 = scmp.lt.s32.totalorder %s954_s21, %s948_s16 }
  0x5d   : > { %390 = vmatprep.subr.mxu0 %v311_v13  ;;  %461 = vmatprep.subr.mxu1 %v313_v14  ;;  %v296_v24 = vld [vmem:[#allocation5 + $0x290] sm:$0xff]  ;;  %v287_v25 = vld [vmem:[#allocation5 + $0x248] sm:$0xff]  ;;  %v289_v26 = vld [vmem:[#allocation5 + $0x258] sm:$0xff]  ;;  %p951_p2 = pneg %p950_p1 }
  0x5e   : > { %391 = vmatpush1.msra.mxu0 %v310_v15  ;;  %462 = vmatpush1.msra.mxu1 %v312_v16  ;;  %v286_v27 = vld [vmem:[#allocation5 + $0x240] sm:$0xff]  ;;  %v288_v28 = vld [vmem:[#allocation5 + $0x250] sm:$0xff]  ;;  %v279_v29 = vld [vmem:[#allocation5 + $0x208] sm:$0xff]  ;;  %p957_p7 = por %p956_p12, %p955_p6 }
  0x5f   : > { %392 = vmatprep.subr.mxu0 %v303_v17  ;;  %463 = vmatprep.subr.mxu1 %v305_v18  ;;  %v281_v30 = vld [vmem:[#allocation5 + $0x218] sm:$0xff]  ;;  %v278_v31 = vld [vmem:[#allocation5 + $0x200] sm:$0xff]  ;;  %v280_v32 = vld [vmem:[#allocation5 + $0x210] sm:$0xff] }
  0x60   : > { %393 = vmatpush1.msra.mxu0 %v302_v19  ;;  %464 = vmatpush1.msra.mxu1 %v304_v20  ;;  %v271_v33 = vld [vmem:[#allocation5 + $0x1c8] sm:$0xff]  ;;  %v273_v34 = vld [vmem:[#allocation5 + $0x1d8] sm:$0xff]  ;;  %v270_v35 = vld [vmem:[#allocation5 + $0x1c0] sm:$0xff]  ;;  %p958_p9 = pnand %p957_p7, %p951_p2 }
  0x61   : > { %394 = vmatprep.subr.mxu0 %v295_v21  ;;  %465 = vmatprep.subr.mxu1 %v297_v22  ;;  %v272_v36 = vld [vmem:[#allocation5 + $0x1d0] sm:$0xff]  ;;  %v263_v37 = vld [vmem:[#allocation5 + $0x188] sm:$0xff]  ;;  %v265_v38 = vld [vmem:[#allocation5 + $0x198] sm:$0xff] }
  0x62   : > { %395 = vmatpush1.msra.mxu0 %v294_v23  ;;  %466 = vmatpush1.msra.mxu1 %v296_v24  ;;  %v262_v39 = vld [vmem:[#allocation5 + $0x180] sm:$0xff]  ;;  %v264_v40 = vld [vmem:[#allocation5 + $0x190] sm:$0xff]  ;;  %v255_v41 = vld [vmem:[#allocation5 + $0x148] sm:$0xff] }
  0x63   : > { %396 = vmatprep.subr.mxu0 %v287_v25  ;;  %467 = vmatprep.subr.mxu1 %v289_v26  ;;  %v257_v42 = vld [vmem:[#allocation5 + $0x158] sm:$0xff]  ;;  %v254_v43 = vld [vmem:[#allocation5 + $0x140] sm:$0xff]  ;;  %v256_v44 = vld [vmem:[#allocation5 + $0x150] sm:$0xff] }
  0x64   : > { %397 = vmatpush1.msra.mxu0 %v286_v27  ;;  %468 = vmatpush1.msra.mxu1 %v288_v28  ;;  %v247_v45 = vld [vmem:[#allocation5 + $0x108] sm:$0xff]  ;;  %v249_v46 = vld [vmem:[#allocation5 + $0x118] sm:$0xff]  ;;  %v246_v47 = vld [vmem:[#allocation5 + $0x100] sm:$0xff] }
  0x65   : > { %398 = vmatprep.subr.mxu0 %v279_v29  ;;  %469 = vmatprep.subr.mxu1 %v281_v30  ;;  %v248_v48 = vld [vmem:[#allocation5 + $0x110] sm:$0xff]  ;;  %v239_v49 = vld [vmem:[#allocation5 + $0xc8] sm:$0xff]  ;;  %v241_v50 = vld [vmem:[#allocation5 + $0xd8] sm:$0xff] }
  0x66   : > { %399 = vmatpush1.msra.mxu0 %v278_v31  ;;  %470 = vmatpush1.msra.mxu1 %v280_v32  ;;  %v238_v51 = vld [vmem:[#allocation5 + $0xc0] sm:$0xff]  ;;  %v240_v52 = vld [vmem:[#allocation5 + $0xd0] sm:$0xff]  ;;  %v231_v53 = vld [vmem:[#allocation5 + $0x88] sm:$0xff] }
  0x67   : > { %400 = vmatprep.subr.mxu0 %v271_v33  ;;  %471 = vmatprep.subr.mxu1 %v273_v34  ;;  %v233_v54 = vld [vmem:[#allocation5 + $0x98] sm:$0xff]  ;;  %v230_v55 = vld [vmem:[#allocation5 + $0x80] sm:$0xff]  ;;  %v232_v56 = vld [vmem:[#allocation5 + $0x90] sm:$0xff] }
  0x68   : > { %401 = vmatpush1.msra.mxu0 %v270_v35  ;;  %472 = vmatpush1.msra.mxu1 %v272_v36  ;;  %v223_v57 = vld [vmem:[#allocation5 + $0x48] sm:$0xff]  ;;  %v225_v58 = vld [vmem:[#allocation5 + $0x58] sm:$0xff]  ;;  %v222_v59 = vld [vmem:[#allocation5 + $0x40] sm:$0xff] }
  0x69   : > { %402 = vmatprep.subr.mxu0 %v263_v37  ;;  %473 = vmatprep.subr.mxu1 %v265_v38  ;;  %v224_v60 = vld [vmem:[#allocation5 + $0x50] sm:$0xff]  ;;  %v215_v61 = vld [vmem:[#allocation5 + $0x8] sm:$0xff]  ;;  %v217_v62 = vld [vmem:[#allocation5 + $0x18] sm:$0xff] }
  0x6a   : > { %403 = vmatpush1.msra.mxu0 %v262_v39  ;;  %474 = vmatpush1.msra.mxu1 %v264_v40  ;;  %v214_v63 = vld [vmem:[#allocation5] sm:$0xff]  ;;  %v216_v1 = vld [vmem:[#allocation5 + $0x10] sm:$0xff]  ;;  %v339_v3 = vld [vmem:[#allocation5 + $0x3e8] sm:$0xff] }
  0x6b   : > { %404 = vmatprep.subr.mxu0 %v255_v41  ;;  %475 = vmatprep.subr.mxu1 %v257_v42  ;;  %v1180_v2 = vld [vmem:[%s1167_s4] sm:$0xff]  ;;  %v338_v5 = vld [vmem:[#allocation5 + $0x3e0] sm:$0xff]  ;;  %v331_v7 = vld [vmem:[#allocation5 + $0x3a8] sm:$0xff] }
  0x6c   : > { %405 = vmatpush1.msra.mxu0 %v254_v43  ;;  %476 = vmatpush1.msra.mxu1 %v256_v44  ;;  %v341_v4 = vld [vmem:[#allocation5 + $0x3f8] sm:$0xff]  ;;  %v340_v6 = vld [vmem:[#allocation5 + $0x3f0] sm:$0xff]  ;;  %v330_v9 = vld [vmem:[#allocation5 + $0x3a0] sm:$0xff] }
  0x6d   : > { %406 = vmatprep.subr.mxu0 %v247_v45  ;;  %477 = vmatprep.subr.mxu1 %v249_v46  ;;  %v333_v8 = vld [vmem:[#allocation5 + $0x3b8] sm:$0xff]  ;;  %v332_v10 = vld [vmem:[#allocation5 + $0x3b0] sm:$0xff]  ;;  %v323_v11 = vld [vmem:[#allocation5 + $0x368] sm:$0xff] }
  0x6e   : > { %407 = vmatpush1.msra.mxu0 %v246_v47  ;;  %478 = vmatpush1.msra.mxu1 %v248_v48  ;;  %v325_v12 = vld [vmem:[#allocation5 + $0x378] sm:$0xff]  ;;  %v322_v13 = vld [vmem:[#allocation5 + $0x360] sm:$0xff]  ;;  %v324_v14 = vld [vmem:[#allocation5 + $0x370] sm:$0xff] }
  0x6f   : > { %408 = vmatprep.subr.mxu0 %v239_v49  ;;  %479 = vmatprep.subr.mxu1 %v241_v50  ;;  %v315_v15 = vld [vmem:[#allocation5 + $0x328] sm:$0xff]  ;;  %v317_v16 = vld [vmem:[#allocation5 + $0x338] sm:$0xff]  ;;  %v314_v17 = vld [vmem:[#allocation5 + $0x320] sm:$0xff] }
  0x70   : > { %409 = vmatpush1.msra.mxu0 %v238_v51  ;;  %480 = vmatpush1.msra.mxu1 %v240_v52  ;;  %v316_v18 = vld [vmem:[#allocation5 + $0x330] sm:$0xff]  ;;  %v307_v19 = vld [vmem:[#allocation5 + $0x2e8] sm:$0xff]  ;;  %v309_v20 = vld [vmem:[#allocation5 + $0x2f8] sm:$0xff] }
  0x71   : > { %410 = vmatprep.subr.mxu0 %v231_v53  ;;  %481 = vmatprep.subr.mxu1 %v233_v54  ;;  %v306_v21 = vld [vmem:[#allocation5 + $0x2e0] sm:$0xff]  ;;  %v308_v22 = vld [vmem:[#allocation5 + $0x2f0] sm:$0xff]  ;;  %v299_v23 = vld [vmem:[#allocation5 + $0x2a8] sm:$0xff] }
  0x72   : > { %411 = vmatpush1.msra.mxu0 %v230_v55  ;;  %482 = vmatpush1.msra.mxu1 %v232_v56  ;;  %v301_v24 = vld [vmem:[#allocation5 + $0x2b8] sm:$0xff]  ;;  %v298_v25 = vld [vmem:[#allocation5 + $0x2a0] sm:$0xff]  ;;  %v300_v26 = vld [vmem:[#allocation5 + $0x2b0] sm:$0xff] }
  0x73   : > { %412 = vmatprep.subr.mxu0 %v223_v57  ;;  %483 = vmatprep.subr.mxu1 %v225_v58  ;;  %v291_v27 = vld [vmem:[#allocation5 + $0x268] sm:$0xff]  ;;  %v293_v28 = vld [vmem:[#allocation5 + $0x278] sm:$0xff]  ;;  %v290_v29 = vld [vmem:[#allocation5 + $0x260] sm:$0xff] }
  0x74   : > { %413 = vmatpush1.msra.mxu0 %v222_v59  ;;  %484 = vmatpush1.msra.mxu1 %v224_v60  ;;  %v292_v30 = vld [vmem:[#allocation5 + $0x270] sm:$0xff]  ;;  %v283_v31 = vld [vmem:[#allocation5 + $0x228] sm:$0xff]  ;;  %v285_v32 = vld [vmem:[#allocation5 + $0x238] sm:$0xff] }
  0x75   : > { %414 = vmatprep.subr.mxu0 %v215_v61  ;;  %485 = vmatprep.subr.mxu1 %v217_v62  ;;  %v282_v33 = vld [vmem:[#allocation5 + $0x220] sm:$0xff]  ;;  %v284_v34 = vld [vmem:[#allocation5 + $0x230] sm:$0xff]  ;;  %v275_v35 = vld [vmem:[#allocation5 + $0x1e8] sm:$0xff] }
  0x76   : > { %415 = vmatpush1.msra.mxu0 %v214_v63  ;;  %486 = vmatpush1.msra.mxu1 %v216_v1  ;;  %v277_v36 = vld [vmem:[#allocation5 + $0x1f8] sm:$0xff]  ;;  %v274_v37 = vld [vmem:[#allocation5 + $0x1e0] sm:$0xff]  ;;  %v276_v38 = vld [vmem:[#allocation5 + $0x1f0] sm:$0xff] }
  0x77   : > { %449 = vmatmul.mubr.f32.vlgmr.msra.gmra.mxu0 %v1180_v2  ;;  %520 = vmatmul.mubr.f32.vlgmr.msra.gmra.mxu1 %v1180_v2  ;;  %v267_v39 = vld [vmem:[#allocation5 + $0x1a8] sm:$0xff]  ;;  %v269_v40 = vld [vmem:[#allocation5 + $0x1b8] sm:$0xff]  ;;  %v266_v41 = vld [vmem:[#allocation5 + $0x1a0] sm:$0xff] }
  0x78   : > { %526 = vmatprep.subr.mxu0 %v339_v3  ;;  %597 = vmatprep.subr.mxu1 %v341_v4  ;;  %v268_v42 = vld [vmem:[#allocation5 + $0x1b0] sm:$0xff]  ;;  %v259_v43 = vld [vmem:[#allocation5 + $0x168] sm:$0xff]  ;;  %v261_v44 = vld [vmem:[#allocation5 + $0x178] sm:$0xff] }
  0x79   : > { %527 = vmatpush1.msra.mxu0 %v338_v5  ;;  %598 = vmatpush1.msra.mxu1 %v340_v6  ;;  %v258_v45 = vld [vmem:[#allocation5 + $0x160] sm:$0xff]  ;;  %v260_v46 = vld [vmem:[#allocation5 + $0x170] sm:$0xff]  ;;  %v251_v47 = vld [vmem:[#allocation5 + $0x128] sm:$0xff]  ;;  %v344_v5 = vlaneseq }
  0x7a   : > { %528 = vmatprep.subr.mxu0 %v331_v7  ;;  %599 = vmatprep.subr.mxu1 %v333_v8  ;;  %v253_v48 = vld [vmem:[#allocation5 + $0x138] sm:$0xff]  ;;  %v250_v49 = vld [vmem:[#allocation5 + $0x120] sm:$0xff]  ;;  %v252_v50 = vld [vmem:[#allocation5 + $0x130] sm:$0xff] }
  0x7b   : > { %529 = vmatpush1.msra.mxu0 %v330_v9  ;;  %600 = vmatpush1.msra.mxu1 %v332_v10  ;;  %v243_v51 = vld [vmem:[#allocation5 + $0xe8] sm:$0xff]  ;;  %v245_v52 = vld [vmem:[#allocation5 + $0xf8] sm:$0xff]  ;;  %v242_v53 = vld [vmem:[#allocation5 + $0xe0] sm:$0xff]  ;;  %v345_v6 = vshrl.u32 %v344_v5, 7 }
  0x7c   : > { %530 = vmatprep.subr.mxu0 %v323_v11  ;;  %601 = vmatprep.subr.mxu1 %v325_v12  ;;  %v244_v54 = vld [vmem:[#allocation5 + $0xf0] sm:$0xff]  ;;  %v235_v55 = vld [vmem:[#allocation5 + $0xa8] sm:$0xff]  ;;  %v237_v56 = vld [vmem:[#allocation5 + $0xb8] sm:$0xff] }
  0x7d   : > { %531 = vmatpush1.msra.mxu0 %v322_v13  ;;  %602 = vmatpush1.msra.mxu1 %v324_v14  ;;  %v234_v57 = vld [vmem:[#allocation5 + $0xa0] sm:$0xff]  ;;  %v236_v58 = vld [vmem:[#allocation5 + $0xb0] sm:$0xff]  ;;  %v227_v59 = vld [vmem:[#allocation5 + $0x68] sm:$0xff]  ;;  %v346_v7 = vsub.s32 0, %v345_v6  ;;  %v354_v8 = vsub.s32 2, %v345_v6  ;;  %v350_v10 = vsub.s32 1, %v345_v6 }
  0x7e   : > { %532 = vmatprep.subr.mxu0 %v315_v15  ;;  %603 = vmatprep.subr.mxu1 %v317_v16  ;;  %v229_v60 = vld [vmem:[#allocation5 + $0x78] sm:$0xff]  ;;  %v226_v61 = vld [vmem:[#allocation5 + $0x60] sm:$0xff]  ;;  %v228_v62 = vld [vmem:[#allocation5 + $0x70] sm:$0xff]  ;;  %v358_v11 = vsub.s32 3, %v345_v6 }
  0x7f   : > { %533 = vmatpush1.msra.mxu0 %v314_v17  ;;  %604 = vmatpush1.msra.mxu1 %v316_v18  ;;  %v219_v63 = vld [vmem:[#allocation5 + $0x28] sm:$0xff]  ;;  %v221_v1 = vld [vmem:[#allocation5 + $0x38] sm:$0xff]  ;;  %v218_v3 = vld [vmem:[#allocation5 + $0x20] sm:$0xff] }
  0x80   : > { %534 = vmatprep.subr.mxu0 %v307_v19  ;;  %605 = vmatprep.subr.mxu1 %v309_v20  ;;  %v220_v4 = vld [vmem:[#allocation5 + $0x30] sm:$0xff]  ;;  %v342_v9 = vld [vmem:[#allocation7] sm:$0xff] }
  0x81   : > { %535 = vmatpush1.msra.mxu0 %v306_v21  ;;  %606 = vmatpush1.msra.mxu1 %v308_v22  ;;  %v347_v12 = vrot.slane %v342_v9, %v346_v7  ;;  %v355_v13 = vrot.slane %v342_v9, %v354_v8  ;;  %v351_v14 = vrot.slane %v342_v9, %v350_v10  ;;  %v362_v22 = vsub.s32 4, %v345_v6 }
  0x82   : > { %536 = vmatprep.subr.mxu0 %v299_v23  ;;  %607 = vmatprep.subr.mxu1 %v301_v24  ;;  %v359_v15 = vrot.slane %v342_v9, %v358_v11  ;;  %v370_v23 = vsub.s32 6, %v345_v6  ;;  %v366_v24 = vsub.s32 5, %v345_v6 }
  0x83   : > { %537 = vmatpush1.msra.mxu0 %v298_v25  ;;  %608 = vmatpush1.msra.mxu1 %v300_v26  ;;  %v374_v25 = vsub.s32 7, %v345_v6  ;;  %v363_v26 = vrot.slane %v342_v9, %v362_v22 }
  0x84   : > { %538 = vmatprep.subr.mxu0 %v291_v27  ;;  %609 = vmatprep.subr.mxu1 %v293_v28  ;;  %v371_v27 = vrot.slane %v342_v9, %v370_v23  ;;  %v367_v28 = vrot.slane %v342_v9, %v366_v24 }
  0x85   : > { %539 = vmatpush1.msra.mxu0 %v290_v29  ;;  %610 = vmatpush1.msra.mxu1 %v292_v30  ;;  %v375_v29 = vrot.slane %v342_v9, %v374_v25 }
  0x86   : > { %540 = vmatprep.subr.mxu0 %v283_v31  ;;  %611 = vmatprep.subr.mxu1 %v285_v32 }
  0x87   : > { %541 = vmatpush1.msra.mxu0 %v282_v33  ;;  %612 = vmatpush1.msra.mxu1 %v284_v34 }
  0x88   : > { %542 = vmatprep.subr.mxu0 %v275_v35  ;;  %613 = vmatprep.subr.mxu1 %v277_v36 }
  0x89   : > { %543 = vmatpush1.msra.mxu0 %v274_v37  ;;  %614 = vmatpush1.msra.mxu1 %v276_v38 }
  0x8a   : > { %544 = vmatprep.subr.mxu0 %v267_v39  ;;  %615 = vmatprep.subr.mxu1 %v269_v40 }
  0x8b   : > { %545 = vmatpush1.msra.mxu0 %v266_v41  ;;  %616 = vmatpush1.msra.mxu1 %v268_v42 }
  0x8c   : > { %546 = vmatprep.subr.mxu0 %v259_v43  ;;  %617 = vmatprep.subr.mxu1 %v261_v44 }
  0x8d   : > { %547 = vmatpush1.msra.mxu0 %v258_v45  ;;  %618 = vmatpush1.msra.mxu1 %v260_v46 }
  0x8e   : > { %548 = vmatprep.subr.mxu0 %v251_v47  ;;  %619 = vmatprep.subr.mxu1 %v253_v48 }
  0x8f   : > { %549 = vmatpush1.msra.mxu0 %v250_v49  ;;  %620 = vmatpush1.msra.mxu1 %v252_v50 }
  0x90   : > { %550 = vmatprep.subr.mxu0 %v243_v51  ;;  %621 = vmatprep.subr.mxu1 %v245_v52 }
  0x91   : > { %551 = vmatpush1.msra.mxu0 %v242_v53  ;;  %622 = vmatpush1.msra.mxu1 %v244_v54 }
  0x92   : > { %552 = vmatprep.subr.mxu0 %v235_v55  ;;  %623 = vmatprep.subr.mxu1 %v237_v56 }
  0x93   : > { %553 = vmatpush1.msra.mxu0 %v234_v57  ;;  %624 = vmatpush1.msra.mxu1 %v236_v58 }
  0x94   : > { %554 = vmatprep.subr.mxu0 %v227_v59  ;;  %625 = vmatprep.subr.mxu1 %v229_v60 }
  0x95   : > { %555 = vmatpush1.msra.mxu0 %v226_v61  ;;  %626 = vmatpush1.msra.mxu1 %v228_v62 }
  0x96   : > { %556 = vmatprep.subr.mxu0 %v219_v63  ;;  %627 = vmatprep.subr.mxu1 %v221_v1 }
  0x97   : > { %557 = vmatpush1.msra.mxu0 %v218_v3  ;;  %590 = vmatprep.mubr.f32.mxu0 %v1023_v0 }
  0x98   : > { %628 = vmatpush1.msra.mxu1 %v220_v4  ;;  %661 = vmatprep.mubr.f32.mxu1 %v1023_v0 }
  0x99   : > { %591 = vmatmul.mubr.f32.vlgmr.msra.gmra.mxu0 %v1180_v2  ;;  %662 = vmatmul.mubr.f32.vlgmr.msra.gmra.mxu1 %v1180_v2 }
 0x137   : > { %v450_v16 = vpop.f32.mrf.mxu0  ;;  %v521_v17 = vpop.f32.mrf.mxu1 }
 0x138   : > { %v451_v18 = vadd.f32 %v450_v16, %v347_v12  ;;  %v522_v0 = vadd.f32 %v521_v17, %v355_v13 }
 0x139   : > { %v452_v19 = vpop.f32.mrf.mxu0  ;;  %v523_v20 = vpop.f32.mrf.mxu1 }
 0x13a   : > { %668 = vst [vmem:[%s212_s20] sm:$0xff] %v451_v18  ;;  %670 = vst [vmem:[%s212_s20 + $0x10] sm:$0xff] %v522_v0  ;;  %v453_v2 = vadd.f32 %v452_v19, %v351_v14  ;;  %v524_v21 = vadd.f32 %v523_v20, %v359_v15 }
 0x13c   : > { %669 = vst [vmem:[%s212_s20 + $0x8] sm:$0xff] %v453_v2  ;;  %671 = vst [vmem:[%s212_s20 + $0x18] sm:$0xff] %v524_v21 }
 0x159   : > { %v592_v30 = vpop.f32.mrf.mxu0  ;;  %v663_v31 = vpop.f32.mrf.mxu1 }
 0x15a   : > { %v593_v32 = vadd.f32 %v592_v30, %v363_v26  ;;  %v664_v33 = vadd.f32 %v663_v31, %v371_v27 }
 0x15b   : > { %v594_v34 = vpop.f32.mrf.mxu0  ;;  %v665_v35 = vpop.f32.mrf.mxu1 }
 0x15c   : > { %672 = vst [vmem:[%s212_s20 + $0x20] sm:$0xff] %v593_v32  ;;  %674 = vst [vmem:[%s212_s20 + $0x30] sm:$0xff] %v664_v33  ;;  %v595_v36 = vadd.f32 %v594_v34, %v367_v28  ;;  %v666_v37 = vadd.f32 %v665_v35, %v375_v29 }
 0x15e   : > { %673 = vst [vmem:[%s212_s20 + $0x28] sm:$0xff] %v595_v36  ;;  %675 = vst [vmem:[%s212_s20 + $0x38] sm:$0xff] %v666_v37 }
 0x15f   : > { %961 = shalt.err (!%p958_p9)
}
 0x160   : > { %s962_s17 = scalar_lea.hbm %s1193_s5, 1024  ;;  %s966_s24 = scalar_lea.hbm %s1233_s3, 2048 }
 0x161   : > { %p963_p13 = scmp.ne.s32.totalorder %s1193_s5, %s962_s17  ;;  %p967_p0 = scmp.lt.s32.totalorder %s1193_s5, %s1233_s3 }
 0x162   : > { %p968_p4 = scmp.lt.s32.totalorder %s966_s24, %s962_s17 }
 0x163   : > { %p964_p5 = pnand %p963_p13, %p1249_p11 }
 0x164   : > { %p969_p8 = por %p968_p4, %p967_p0 }
 0x165   : > { %p965_p10 = pneg %p964_p5 }
 0x167   : > { %p970_p3 = pnand %p969_p8, %p965_p10 }
 0x169   : > { %973 = shalt.err (!%p970_p3)
}
 0x16a   : > { %808 = dma.vmem_to_hbm [thread:$0]  (%p1249_p11), %s692_s27, 1024, %s1193_s5, %s677_s6  }
 0x16b PF: > { %s703_s4 = sand.u32 1, %s1004_s12   ;;  %p1250_p1 = scmp.ne.s32.totalorder %s1239_s19, 0 }
 0x16c   : > { %p1251_p2 = scmp.ge.s32.totalorder %s1016_s15, 2  ;;  %s704_s18 = scalar_lea.sflag [#allocation4], %s703_s4 }
 0x16e   : > { %p822_p6 = pnand %p1251_p2, %p1250_p1 }
 0x170   : > { %p823_p12 = pneg %p822_p6 }
 0x172   : > { %999 = dma.done.wait (%p823_p12), %s704_s18, 1024  }
 0x173   : > { %1001 = vsyncadd (%p823_p12), %s704_s18, 4294966272  ;;  %p17_p7 = scmp.ge.s32.totalorder %s1117_s7, 4   ;;  %s1252_s12 = smov %s1008_s13 }
 0x174   : > { %s1253_s13 = smov %s1012_s14  ;;  %s1254_s14 = smov %s1133_s11 }
 0x175   : > { %s1255_s15 = smov %s1117_s7  ;;  %19 = sbr.rel (!%p17_p7) target bundleno = 6 (0x6), region = 85 }
 0x17a   :  { %709 = vsyncpa [#allocation3], 1 }
 0x17b   :  { %711 = vsyncpa [#allocation3 + $0x1], 1 }
 0x17c   :  { %712 = vsyncpa [#allocation6], 1 }
 0x17d   :  { %713 = vsyncpa [#allocation4], 1 }
 0x17e   :  { %715 = vsyncpa [#allocation4 + $0x1], 1 }

</bundles_post_ra>
